<compile_context>
chip_gen: v7x
topology: tpu7x:2x2x1
jax: 0.10.0
libtpu: 0.0.40
codegen_flags: <defaults>
</compile_context>

<pallas_src>
import math
import functools

import jax
import jax.numpy as jnp
from jax import lax
from jax.experimental import pallas as pl
from jax.experimental.pallas import tpu as pltpu


# --------------------------------------------------------------------------- helpers
def _round_up(x, m):
    return ((x + m - 1) // m) * m


def _row_block(rows, max_block=256):
    for cand in (max_block, 128, 64, 32, 16, 8):
        if cand <= rows and rows % cand == 0:
            return cand
    return rows


# --------------------------------------------------------------------------- embedding
def _embed_kernel(ids_ref, lut_ref, pe_ref, out_ref, gather_ref, *, scale, tokens_per_step):
    base = pl.program_id(0) * tokens_per_step
    # Gather `tokens_per_step` rows from the VMEM-resident embedding table.
    # Static unroll -> static store offsets; only the LUT row index is dynamic.
    for t in range(tokens_per_step):
        tok = ids_ref[base + t]                                   # SMEM scalar read
        gather_ref[pl.ds(t, 1), :] = lut_ref[pl.ds(tok, 1), :]    # dynamic-row VMEM load
    # Scale + positional encoding fused once over the whole block; a single
    # lane-dense (T, d_model) store.
    out_ref[...] = gather_ref[...] * scale + pe_ref[...]


@functools.lru_cache(maxsize=None)
def _build_embed_call(n_pad, vocab, d_model, tokens_per_step, scale):
    kernel = functools.partial(_embed_kernel, scale=scale, tokens_per_step=tokens_per_step)
    # VMEM budget: resident LUT is double-buffered by the pipeline (2x) + io blocks.
    table_bytes = 2 * vocab * d_model * 4
    block_bytes = 6 * tokens_per_step * d_model * 4
    vmem_limit = min(100 * 1024 * 1024,
                     max(32 * 1024 * 1024, table_bytes + block_bytes + (2 << 20)))
    return pl.pallas_call(
        kernel,
        out_shape=jax.ShapeDtypeStruct((n_pad, d_model), jnp.float32),
        grid_spec=pltpu.PrefetchScalarGridSpec(
            num_scalar_prefetch=1,                  # token ids -> SMEM
            grid=(n_pad // tokens_per_step,),       # T tokens per grid step
            in_specs=[
                # whole embedding table resident in VMEM (constant block index)
                pl.BlockSpec((vocab, d_model), lambda i, ids: (0, 0)),
                # positional-encoding rows for this block of tokens
                pl.BlockSpec((tokens_per_step, d_model), lambda i, ids: (i, 0)),
            ],
            out_specs=pl.BlockSpec((tokens_per_step, d_model), lambda i, ids: (i, 0)),
            scratch_shapes=[pltpu.VMEM((tokens_per_step, d_model), jnp.float32)],
        ),
        compiler_params=pltpu.CompilerParams(
            dimension_semantics=("parallel",),      # independent token blocks
            vmem_limit_bytes=int(vmem_limit),
        ),
    )


def embed(tokens, lut, pe, *, tokens_per_step=64):
    """Embeddings(vocab, d_model)(x) * sqrt(d_model) + PositionalEncoding (eval)."""
    B, S = tokens.shape
    vocab, d_model = lut.shape
    n = B * S
    t = min(tokens_per_step, _round_up(n, 8))
    t = max(8, (t // 8) * 8)
    n_pad = _round_up(n, t)

    ids = jnp.clip(tokens.reshape(n).astype(jnp.int32), 0, vocab - 1)   # guard OOB ids
    ids = jnp.pad(ids, (0, n_pad - n))
    pe_rows = jnp.broadcast_to(pe[:S], (B, S, d_model)).reshape(n, d_model)
    pe_rows = jnp.pad(pe_rows, ((0, n_pad - n), (0, 0)))

    call = _build_embed_call(n_pad, vocab, d_model, t, float(math.sqrt(d_model)))
    out = call(ids, lut, pe_rows)
    return out[:n]                                                       # (B*S, d_model)


# --------------------------------------------------------------------------- layernorm
def _layernorm_kernel(x_ref, a_ref, b_ref, out_ref, *, eps):
    x = x_ref[...]
    mu = jnp.mean(x, axis=-1, keepdims=True)
    xc = x - mu
    var = jnp.sum(xc * xc, axis=-1, keepdims=True) / (x.shape[-1] - 1)   # unbiased (torch.std)
    out_ref[...] = a_ref[...] * xc / (jnp.sqrt(var) + eps) + b_ref[...]


@functools.lru_cache(maxsize=None)
def _build_layernorm_call(rows, dim, tr, eps):
    kernel = functools.partial(_layernorm_kernel, eps=eps)
    return pl.pallas_call(
        kernel,
        out_shape=jax.ShapeDtypeStruct((rows, dim), jnp.float32),
        grid_spec=pltpu.PrefetchScalarGridSpec(
            num_scalar_prefetch=0,
            grid=(rows // tr,),
            in_specs=[pl.BlockSpec((tr, dim), lambda i: (i, 0)),
                      pl.BlockSpec((1, dim), lambda i: (0, 0)),
                      pl.BlockSpec((1, dim), lambda i: (0, 0))],
            out_specs=pl.BlockSpec((tr, dim), lambda i: (i, 0)),
        ),
        compiler_params=pltpu.CompilerParams(dimension_semantics=("parallel",)),
    )


def layernorm(x, a, b, eps=1e-6):
    rows, dim = x.shape
    call = _build_layernorm_call(rows, dim, _row_block(rows), float(eps))
    return call(x, a.reshape(1, dim), b.reshape(1, dim))


# --------------------------------------------------------------------------- linear
def _linear_kernel(x_ref, w_ref, b_ref, out_ref, *, activation):
    y = jnp.dot(x_ref[...], w_ref[...], preferred_element_type=jnp.float32) + b_ref[...]
    if activation == "relu":
        y = jnp.maximum(y, 0.0)
    out_ref[...] = y.astype(out_ref.dtype)


def _linear_residual_kernel(x_ref, w_ref, b_ref, res_ref, out_ref, *, activation):
    y = jnp.dot(x_ref[...], w_ref[...], preferred_element_type=jnp.float32) + b_ref[...]
    if activation == "relu":
        y = jnp.maximum(y, 0.0)
    out_ref[...] = (y + res_ref[...]).astype(out_ref.dtype)


@functools.lru_cache(maxsize=None)
def _build_linear_call(rows, d_in, d_out, tr, activation, residual):
    kernel = functools.partial(
        _linear_residual_kernel if residual else _linear_kernel, activation=activation)
    in_specs = [pl.BlockSpec((tr, d_in), lambda i: (i, 0)),
                pl.BlockSpec((d_in, d_out), lambda i: (0, 0)),   # weight resident in VMEM
                pl.BlockSpec((1, d_out), lambda i: (0, 0))]
    if residual:
        in_specs.append(pl.BlockSpec((tr, d_out), lambda i: (i, 0)))
    return pl.pallas_call(
        kernel,
        out_shape=jax.ShapeDtypeStruct((rows, d_out), jnp.float32),
        grid_spec=pltpu.PrefetchScalarGridSpec(
            num_scalar_prefetch=0,
            grid=(rows // tr,),
            in_specs=in_specs,
            out_specs=pl.BlockSpec((tr, d_out), lambda i: (i, 0)),
        ),
        compiler_params=pltpu.CompilerParams(dimension_semantics=("parallel",)),
    )


def linear(x, w, b, *, activation="none", residual=None):
    rows, d_in = x.shape
    d_out = w.shape[1]
    call = _build_linear_call(rows, d_in, d_out, _row_block(rows),
                              activation, residual is not None)
    args = (x, w, b.reshape(1, d_out))
    if residual is not None:
        args = args + (residual,)
    return call(*args)


# --------------------------------------------------------------------------- attention
def _attention_kernel(q_ref, k_ref, v_ref, m_ref, out_ref, *, sm_scale):
    q = q_ref[0]                                              # (Sq, dk)
    k = k_ref[0]                                              # (Sk, dk)
    v = v_ref[0]                                              # (Sk, dk)
    s = lax.dot_general(q, k, (((1,), (1,)), ((), ())),
                        preferred_element_type=jnp.float32) * sm_scale   # (Sq, Sk)
    s = jnp.where(m_ref[0] > 0.0, s, -1e9)
    s = s - jnp.max(s, axis=-1, keepdims=True)
    p = jnp.exp(s)
    p = p / jnp.sum(p, axis=-1, keepdims=True)
    out_ref[0] = jnp.dot(p, v, preferred_element_type=jnp.float32).astype(out_ref.dtype)


@functools.lru_cache(maxsize=None)
def _build_attention_call(bh, heads, sq, sk, dk):
    kernel = functools.partial(_attention_kernel, sm_scale=1.0 / math.sqrt(dk))
    return pl.pallas_call(
        kernel,
        out_shape=jax.ShapeDtypeStruct((bh, sq, dk), jnp.float32),
        grid_spec=pltpu.PrefetchScalarGridSpec(
            num_scalar_prefetch=0,
            grid=(bh,),                                        # one (batch, head) per step
            in_specs=[pl.BlockSpec((1, sq, dk), lambda i: (i, 0, 0)),
                      pl.BlockSpec((1, sk, dk), lambda i: (i, 0, 0)),
                      pl.BlockSpec((1, sk, dk), lambda i: (i, 0, 0)),
                      pl.BlockSpec((1, sq, sk), lambda i: (i // heads, 0, 0))],
            out_specs=pl.BlockSpec((1, sq, dk), lambda i: (i, 0, 0)),
        ),
        compiler_params=pltpu.CompilerParams(dimension_semantics=("parallel",)),
    )


def multi_head_attention(q2d, k2d, v2d, mask, *, batch, sq, sk, heads):
    d_model = q2d.shape[-1]
    dk = d_model // heads

    def split(x, s):
        return x.reshape(batch, s, heads, dk).transpose(0, 2, 1, 3).reshape(batch * heads, s, dk)

    mask_f = jnp.broadcast_to(mask, (batch, sq, sk)).astype(jnp.float32)
    call = _build_attention_call(batch * heads, heads, sq, sk, dk)
    ctx = call(split(q2d, sq), split(k2d, sk), split(v2d, sk), mask_f)
    return ctx.reshape(batch, heads, sq, dk).transpose(0, 2, 1, 3).reshape(batch * sq, d_model)


# --------------------------------------------------------------------------- layers
def _attn_sublayer(p, x_q2d, x_kv2d, mask, *, batch, sq, sk, heads, residual):
    q = linear(x_q2d, p["wq"], p["bq"])
    k = linear(x_kv2d, p["wk"], p["bk"])
    v = linear(x_kv2d, p["wv"], p["bv"])
    ctx = multi_head_attention(q, k, v, mask, batch=batch, sq=sq, sk=sk, heads=heads)
    return linear(ctx, p["wo"], p["bo"], residual=residual)


def encoder_layer(p, x, src_mask, *, batch, s_src, heads):
    xn = layernorm(x, p["ln1_a"], p["ln1_b"])
    x = _attn_sublayer(p["self_attn"], xn, xn, src_mask,
                       batch=batch, sq=s_src, sk=s_src, heads=heads, residual=x)
    xn = layernorm(x, p["ln2_a"], p["ln2_b"])
    h = linear(xn, p["ffn_w1"], p["ffn_b1"], activation="relu")
    return linear(h, p["ffn_w2"], p["ffn_b2"], residual=x)


def decoder_layer(p, x, memory, src_mask, tgt_mask, *, batch, s_tgt, s_src, heads):
    xn = layernorm(x, p["ln1_a"], p["ln1_b"])
    x = _attn_sublayer(p["self_attn"], xn, xn, tgt_mask,
                       batch=batch, sq=s_tgt, sk=s_tgt, heads=heads, residual=x)
    xn = layernorm(x, p["ln2_a"], p["ln2_b"])
    x = _attn_sublayer(p["src_attn"], xn, memory, src_mask,
                       batch=batch, sq=s_tgt, sk=s_src, heads=heads, residual=x)
    xn = layernorm(x, p["ln3_a"], p["ln3_b"])
    h = linear(xn, p["ffn_w1"], p["ffn_b1"], activation="relu")
    return linear(h, p["ffn_w2"], p["ffn_b2"], residual=x)


def encode(params, src, src_mask, *, heads):
    batch, s_src = src.shape
    x = embed(src, params["src_lut"], params["pe"],
              tokens_per_step=params["tokens_per_step"])
    for p in params["encoder_layers"]:
        x = encoder_layer(p, x, src_mask, batch=batch, s_src=s_src, heads=heads)
    return layernorm(x, params["enc_ln_a"], params["enc_ln_b"])


def decode(params, memory, src_mask, tgt, tgt_mask, *, s_src, heads):
    batch, s_tgt = tgt.shape
    x = embed(tgt, params["tgt_lut"], params["pe"],
              tokens_per_step=params["tokens_per_step"])
    for p in params["decoder_layers"]:
        x = decoder_layer(p, x, memory, src_mask, tgt_mask,
                          batch=batch, s_tgt=s_tgt, s_src=s_src, heads=heads)
    return layernorm(x, params["dec_ln_a"], params["dec_ln_b"])


def transformer_forward(params, src, tgt, src_mask, tgt_mask, *, heads):
    """Pallas forward matching Transformer.forward(src, tgt, src_mask, tgt_mask)."""
    batch, s_src = src.shape
    _, s_tgt = tgt.shape
    memory = encode(params, src, src_mask, heads=heads)
    out = decode(params, memory, src_mask, tgt, tgt_mask, s_src=s_src, heads=heads)
    # NOTE: Transformer.forward() does not apply self.generator, so neither do we.
    return out.reshape(batch, s_tgt, -1)


# --------------------------------------------------------------------------- params
def init_params(key, *, src_vocab, tgt_vocab, d_model, d_ff, heads, n_layers,
                max_len, tokens_per_step):
    key_iter = iter(jax.random.split(key, 1024))

    def dense(d_in, d_out):
        w = jax.random.normal(next(key_iter), (d_in, d_out), jnp.float32) / math.sqrt(d_in)
        return w, jnp.zeros((d_out,), jnp.float32)

    def attn_params():
        wq, bq = dense(d_model, d_model)
        wk, bk = dense(d_model, d_model)
        wv, bv = dense(d_model, d_model)
        wo, bo = dense(d_model, d_model)
        return dict(wq=wq, bq=bq, wk=wk, bk=bk, wv=wv, bv=bv, wo=wo, bo=bo)

    def ln():
        return jnp.ones((d_model,), jnp.float32), jnp.zeros((d_model,), jnp.float32)

    def enc_layer():
        a1, b1 = ln(); a2, b2 = ln()
        w1, bb1 = dense(d_model, d_ff); w2, bb2 = dense(d_ff, d_model)
        return dict(ln1_a=a1, ln1_b=b1, self_attn=attn_params(),
                    ln2_a=a2, ln2_b=b2,
                    ffn_w1=w1, ffn_b1=bb1, ffn_w2=w2, ffn_b2=bb2)

    def dec_layer():
        a1, b1 = ln(); a2, b2 = ln(); a3, b3 = ln()
        w1, bb1 = dense(d_model, d_ff); w2, bb2 = dense(d_ff, d_model)
        return dict(ln1_a=a1, ln1_b=b1, self_attn=attn_params(),
                    ln2_a=a2, ln2_b=b2, src_attn=attn_params(),
                    ln3_a=a3, ln3_b=b3,
                    ffn_w1=w1, ffn_b1=bb1, ffn_w2=w2, ffn_b2=bb2)

    # sinusoidal positional-encoding table
    pos = jnp.arange(max_len, dtype=jnp.float32)[:, None]
    div = jnp.exp(jnp.arange(0, d_model, 2, dtype=jnp.float32)
                  * (-math.log(10000.0) / d_model))
    pe = jnp.zeros((max_len, d_model), jnp.float32)
    pe = pe.at[:, 0::2].set(jnp.sin(pos * div)).at[:, 1::2].set(jnp.cos(pos * div))

    enc_a, enc_b = ln()
    dec_a, dec_b = ln()
    # TODO(synk): self.generator (Linear + log_softmax) is not applied by
    # Transformer.forward(), so it is intentionally not implemented here.
    return dict(
        src_lut=jax.random.normal(next(key_iter), (src_vocab, d_model), jnp.float32),
        tgt_lut=jax.random.normal(next(key_iter), (tgt_vocab, d_model), jnp.float32),
        pe=pe,
        encoder_layers=[enc_layer() for _ in range(n_layers)],
        decoder_layers=[dec_layer() for _ in range(n_layers)],
        enc_ln_a=enc_a, enc_ln_b=enc_b, dec_ln_a=dec_a, dec_ln_b=dec_b,
        tokens_per_step=tokens_per_step,
    )


# --------------------------------------------------------------------------- pure-JAX reference
def _ref_layernorm(x, a, b, eps=1e-6):
    mu = jnp.mean(x, axis=-1, keepdims=True)
    xc = x - mu
    var = jnp.sum(xc * xc, axis=-1, keepdims=True) / (x.shape[-1] - 1)
    return a * xc / (jnp.sqrt(var) + eps) + b


def _ref_attention(p, xq, xkv, mask, heads):
    B, Sq, D = xq.shape
    Sk = xkv.shape[1]
    dk = D // heads
    q = (xq @ p["wq"] + p["bq"]).reshape(B, Sq, heads, dk).transpose(0, 2, 1, 3)
    k = (xkv @ p["wk"] + p["bk"]).reshape(B, Sk, heads, dk).transpose(0, 2, 1, 3)
    v = (xkv @ p["wv"] + p["bv"]).reshape(B, Sk, heads, dk).transpose(0, 2, 1, 3)
    s = jnp.einsum("bhqd,bhkd->bhqk", q, k) / math.sqrt(dk)
    mask_b = jnp.broadcast_to(mask, (B, Sq, Sk))[:, None, :, :]
    s = jnp.where(mask_b > 0, s, -1e9)
    p_attn = jax.nn.softmax(s, axis=-1)
    ctx = jnp.einsum("bhqk,bhkd->bhqd", p_attn, v).transpose(0, 2, 1, 3).reshape(B, Sq, D)
    return ctx @ p["wo"] + p["bo"]


def _ref_embed(tokens, lut, pe):
    d_model = lut.shape[1]
    return lut[tokens] * math.sqrt(d_model) + pe[: tokens.shape[1]][None, :, :]


def _ref_encoder_layer(p, x, mask, heads):
    xn = _ref_layernorm(x, p["ln1_a"], p["ln1_b"])
    x = x + _ref_attention(p["self_attn"], xn, xn, mask, heads)
    xn = _ref_layernorm(x, p["ln2_a"], p["ln2_b"])
    h = jnp.maximum(xn @ p["ffn_w1"] + p["ffn_b1"], 0.0)
    return x + (h @ p["ffn_w2"] + p["ffn_b2"])


def _ref_decoder_layer(p, x, memory, src_mask, tgt_mask, heads):
    xn = _ref_layernorm(x, p["ln1_a"], p["ln1_b"])
    x = x + _ref_attention(p["self_attn"], xn, xn, tgt_mask, heads)
    xn = _ref_layernorm(x, p["ln2_a"], p["ln2_b"])
    x = x + _ref_attention(p["src_attn"], xn, memory, src_mask, heads)
    xn = _ref_layernorm(x, p["ln3_a"], p["ln3_b"])
    h = jnp.maximum(xn @ p["ffn_w1"] + p["ffn_b1"], 0.0)
    return x + (h @ p["ffn_w2"] + p["ffn_b2"])


def reference_forward(params, src, tgt, src_mask, tgt_mask, *, heads):
    x = _ref_embed(src, params["src_lut"], params["pe"])
    for p in params["encoder_layers"]:
        x = _ref_encoder_layer(p, x, src_mask, heads)
    memory = _ref_layernorm(x, params["enc_ln_a"], params["enc_ln_b"])
    y = _ref_embed(tgt, params["tgt_lut"], params["pe"])
    for p in params["decoder_layers"]:
        y = _ref_decoder_layer(p, y, memory, src_mask, tgt_mask, heads)
    return _ref_layernorm(y, params["dec_ln_a"], params["dec_ln_b"])


# --------------------------------------------------------------------------- main
if __name__ == "__main__":
    B, S_SRC, S_TGT = 2, 8, 8
    D_MODEL, D_FF, HEADS, N_LAYERS = 128, 256, 4, 2
    SRC_VOCAB, TGT_VOCAB = 100, 96
    TOKENS_PER_STEP = 8          # small so the toy shapes still exercise a multi-step grid

    root = jax.random.PRNGKey(0)
    k_params, k_src, k_tgt = jax.random.split(root, 3)

    params = init_params(k_params, src_vocab=SRC_VOCAB, tgt_vocab=TGT_VOCAB,
                         d_model=D_MODEL, d_ff=D_FF, heads=HEADS, n_layers=N_LAYERS,
                         max_len=64, tokens_per_step=TOKENS_PER_STEP)

    src = jax.random.randint(k_src, (B, S_SRC), 0, SRC_VOCAB, dtype=jnp.int32)
    tgt = jax.random.randint(k_tgt, (B, S_TGT), 0, TGT_VOCAB, dtype=jnp.int32)

    src_mask = jnp.ones((B, 1, S_SRC), dtype=jnp.float32)                 # no padding
    causal = jnp.tril(jnp.ones((S_TGT, S_TGT), dtype=jnp.float32))
    tgt_mask = jnp.broadcast_to(causal, (B, S_TGT, S_TGT))                # subsequent mask

    out = transformer_forward(params, src, tgt, src_mask, tgt_mask, heads=HEADS)
    out = jax.block_until_ready(out)
    assert out.shape == (B, S_TGT, D_MODEL)

    with jax.default_matmul_precision("highest"):
        ref = reference_forward(params, src, tgt, src_mask, tgt_mask, heads=HEADS)
        ref = jax.block_until_ready(ref)

    rel_err = jnp.linalg.norm(out - ref) / (jnp.linalg.norm(ref) + 1e-9)
    assert float(rel_err) < 2e-2, f"mismatch vs reference: rel_err={float(rel_err):.3e}"

    print("KERNEL_OK")
</pallas_src>

<mosaic_0001>
module attributes {stable_mosaic.version = 11 : i64} {
  func.func @_embed_kernel(%arg0: i32, %arg1: memref<16xi32, #tpu.memory_space<smem>>, %arg2: memref<100x128xf32, #tpu.memory_space<vmem>>, %arg3: memref<8x128xf32, #tpu.memory_space<vmem>>, %arg4: memref<8x128xf32, #tpu.memory_space<vmem>>, %arg5: memref<8x128xf32, #tpu.memory_space<vmem>>) attributes {dimension_semantics = [#tpu.dimension_semantics<parallel>], iteration_bounds = array<i64: 2>, scalar_prefetch = 1 : i64, scratch_operands = 1 : i64, tpu.core_type = #tpu.core_type<tc>, window_params = [{pipeline_mode = #tpu.pipeline_mode<synchronous>, transform_indices = @transform_0, window_bounds = array<i64: 100, 128>}, {transform_indices = @transform_1, window_bounds = array<i64: 8, 128>}, {transform_indices = @transform_2, window_bounds = array<i64: 8, 128>}]} {
    %c8_i32 = arith.constant 8 : i32
    %0 = arith.muli %arg0, %c8_i32 : i32
    %c0_i32 = arith.constant 0 : i32
    %1 = arith.addi %0, %c0_i32 : i32
    %2 = arith.index_cast %1 : i32 to index
    %3 = memref.load %arg1[%2] : memref<16xi32, #tpu.memory_space<smem>>
    %4 = arith.index_cast %3 : i32 to index
    %c0 = arith.constant 0 : index
    %5 = vector.load %arg2[%4, %c0] : memref<100x128xf32, #tpu.memory_space<vmem>>, vector<1x128xf32>
    %c0_0 = arith.constant 0 : index
    %c0_1 = arith.constant 0 : index
    %6 = vector.load %arg5[%c0_0, %c0_1] : memref<8x128xf32, #tpu.memory_space<vmem>>, vector<1x128xf32>
    tpu.vector_store %arg5[%c0_0, %c0_1], %5 {strides = array<i32>} : memref<8x128xf32, #tpu.memory_space<vmem>>, vector<1x128xf32>,
    %c1_i32 = arith.constant 1 : i32
    %7 = arith.addi %0, %c1_i32 : i32
    %8 = arith.index_cast %7 : i32 to index
    %9 = memref.load %arg1[%8] : memref<16xi32, #tpu.memory_space<smem>>
    %10 = arith.index_cast %9 : i32 to index
    %c0_2 = arith.constant 0 : index
    %11 = vector.load %arg2[%10, %c0_2] : memref<100x128xf32, #tpu.memory_space<vmem>>, vector<1x128xf32>
    %c1 = arith.constant 1 : index
    %c0_3 = arith.constant 0 : index
    %12 = vector.load %arg5[%c1, %c0_3] : memref<8x128xf32, #tpu.memory_space<vmem>>, vector<1x128xf32>
    tpu.vector_store %arg5[%c1, %c0_3], %11 {strides = array<i32>} : memref<8x128xf32, #tpu.memory_space<vmem>>, vector<1x128xf32>,
    %c2_i32 = arith.constant 2 : i32
    %13 = arith.addi %0, %c2_i32 : i32
    %14 = arith.index_cast %13 : i32 to index
    %15 = memref.load %arg1[%14] : memref<16xi32, #tpu.memory_space<smem>>
    %16 = arith.index_cast %15 : i32 to index
    %c0_4 = arith.constant 0 : index
    %17 = vector.load %arg2[%16, %c0_4] : memref<100x128xf32, #tpu.memory_space<vmem>>, vector<1x128xf32>
    %c2 = arith.constant 2 : index
    %c0_5 = arith.constant 0 : index
    %18 = vector.load %arg5[%c2, %c0_5] : memref<8x128xf32, #tpu.memory_space<vmem>>, vector<1x128xf32>
    tpu.vector_store %arg5[%c2, %c0_5], %17 {strides = array<i32>} : memref<8x128xf32, #tpu.memory_space<vmem>>, vector<1x128xf32>,
    %c3_i32 = arith.constant 3 : i32
    %19 = arith.addi %0, %c3_i32 : i32
    %20 = arith.index_cast %19 : i32 to index
    %21 = memref.load %arg1[%20] : memref<16xi32, #tpu.memory_space<smem>>
    %22 = arith.index_cast %21 : i32 to index
    %c0_6 = arith.constant 0 : index
    %23 = vector.load %arg2[%22, %c0_6] : memref<100x128xf32, #tpu.memory_space<vmem>>, vector<1x128xf32>
    %c3 = arith.constant 3 : index
    %c0_7 = arith.constant 0 : index
    %24 = vector.load %arg5[%c3, %c0_7] : memref<8x128xf32, #tpu.memory_space<vmem>>, vector<1x128xf32>
    tpu.vector_store %arg5[%c3, %c0_7], %23 {strides = array<i32>} : memref<8x128xf32, #tpu.memory_space<vmem>>, vector<1x128xf32>,
    %c4_i32 = arith.constant 4 : i32
    %25 = arith.addi %0, %c4_i32 : i32
    %26 = arith.index_cast %25 : i32 to index
    %27 = memref.load %arg1[%26] : memref<16xi32, #tpu.memory_space<smem>>
    %28 = arith.index_cast %27 : i32 to index
    %c0_8 = arith.constant 0 : index
    %29 = vector.load %arg2[%28, %c0_8] : memref<100x128xf32, #tpu.memory_space<vmem>>, vector<1x128xf32>
    %c4 = arith.constant 4 : index
    %c0_9 = arith.constant 0 : index
    %30 = vector.load %arg5[%c4, %c0_9] : memref<8x128xf32, #tpu.memory_space<vmem>>, vector<1x128xf32>
    tpu.vector_store %arg5[%c4, %c0_9], %29 {strides = array<i32>} : memref<8x128xf32, #tpu.memory_space<vmem>>, vector<1x128xf32>,
    %c5_i32 = arith.constant 5 : i32
    %31 = arith.addi %0, %c5_i32 : i32
    %32 = arith.index_cast %31 : i32 to index
    %33 = memref.load %arg1[%32] : memref<16xi32, #tpu.memory_space<smem>>
    %34 = arith.index_cast %33 : i32 to index
    %c0_10 = arith.constant 0 : index
    %35 = vector.load %arg2[%34, %c0_10] : memref<100x128xf32, #tpu.memory_space<vmem>>, vector<1x128xf32>
    %c5 = arith.constant 5 : index
    %c0_11 = arith.constant 0 : index
    %36 = vector.load %arg5[%c5, %c0_11] : memref<8x128xf32, #tpu.memory_space<vmem>>, vector<1x128xf32>
    tpu.vector_store %arg5[%c5, %c0_11], %35 {strides = array<i32>} : memref<8x128xf32, #tpu.memory_space<vmem>>, vector<1x128xf32>,
    %c6_i32 = arith.constant 6 : i32
    %37 = arith.addi %0, %c6_i32 : i32
    %38 = arith.index_cast %37 : i32 to index
    %39 = memref.load %arg1[%38] : memref<16xi32, #tpu.memory_space<smem>>
    %40 = arith.index_cast %39 : i32 to index
    %c0_12 = arith.constant 0 : index
    %41 = vector.load %arg2[%40, %c0_12] : memref<100x128xf32, #tpu.memory_space<vmem>>, vector<1x128xf32>
    %c6 = arith.constant 6 : index
    %c0_13 = arith.constant 0 : index
    %42 = vector.load %arg5[%c6, %c0_13] : memref<8x128xf32, #tpu.memory_space<vmem>>, vector<1x128xf32>
    tpu.vector_store %arg5[%c6, %c0_13], %41 {strides = array<i32>} : memref<8x128xf32, #tpu.memory_space<vmem>>, vector<1x128xf32>,
    %c7_i32 = arith.constant 7 : i32
    %43 = arith.addi %0, %c7_i32 : i32
    %44 = arith.index_cast %43 : i32 to index
    %45 = memref.load %arg1[%44] : memref<16xi32, #tpu.memory_space<smem>>
    %46 = arith.index_cast %45 : i32 to index
    %c0_14 = arith.constant 0 : index
    %47 = vector.load %arg2[%46, %c0_14] : memref<100x128xf32, #tpu.memory_space<vmem>>, vector<1x128xf32>
    %c7 = arith.constant 7 : index
    %c0_15 = arith.constant 0 : index
    %48 = vector.load %arg5[%c7, %c0_15] : memref<8x128xf32, #tpu.memory_space<vmem>>, vector<1x128xf32>
    tpu.vector_store %arg5[%c7, %c0_15], %47 {strides = array<i32>} : memref<8x128xf32, #tpu.memory_space<vmem>>, vector<1x128xf32>,
    %c0_16 = arith.constant 0 : index
    %c0_17 = arith.constant 0 : index
    %49 = vector.load %arg5[%c0_16, %c0_17] : memref<8x128xf32, #tpu.memory_space<vmem>>, vector<8x128xf32>
    %cst = arith.constant 11.3137083 : f32
    %50 = vector.broadcast %cst : f32 to vector<8x128xf32>
    %51 = arith.mulf %49, %50 : vector<8x128xf32>
    %c0_18 = arith.constant 0 : index
    %c0_19 = arith.constant 0 : index
    %52 = vector.load %arg3[%c0_18, %c0_19] : memref<8x128xf32, #tpu.memory_space<vmem>>, vector<8x128xf32>
    %53 = arith.addf %51, %52 : vector<8x128xf32>
    %c0_20 = arith.constant 0 : index
    %c0_21 = arith.constant 0 : index
    %54 = vector.load %arg4[%c0_20, %c0_21] : memref<8x128xf32, #tpu.memory_space<vmem>>, vector<8x128xf32>
    tpu.vector_store %arg4[%c0_20, %c0_21], %53 {strides = array<i32>} : memref<8x128xf32, #tpu.memory_space<vmem>>, vector<8x128xf32>,
    return
  }
  func.func @transform_0(%arg0: i32, %arg1: memref<16xi32, #tpu.memory_space<smem>>) -> (i32, i32) {
    %c0_i32 = arith.constant 0 : i32
    %c0_i32_0 = arith.constant 0 : i32
    %c0_i32_1 = arith.constant 0 : i32
    return %c0_i32, %c0_i32_0 : i32, i32
  }
  func.func @transform_1(%arg0: i32, %arg1: memref<16xi32, #tpu.memory_space<smem>>) -> (i32, i32) {
    %c0_i32 = arith.constant 0 : i32
    %c0_i32_0 = arith.constant 0 : i32
    return %arg0, %c0_i32 : i32, i32
  }
  func.func @transform_2(%arg0: i32, %arg1: memref<16xi32, #tpu.memory_space<smem>>) -> (i32, i32) {
    %c0_i32 = arith.constant 0 : i32
    %c0_i32_0 = arith.constant 0 : i32
    return %arg0, %c0_i32 : i32, i32
  }
}

</mosaic_0001>

<bundles_post_ra>
// kernel: tpu_custom_call.1
= control target key start
LH: loop header
LB: loop body
LE: loop exit
PB: predicated region body
PF: predicated region fallthrough
CT: control target
= control target key end

     0   :  { %s787_s0 = inlined_call_operand.hbm [shape: s32[16], index: 0, kind: input, shape index: {}]   ;;  %s788_s1 = inlined_call_operand.hbm [shape: f32[100,128], index: 1, kind: input, shape index: {}]   ;;  %s789_s2 = inlined_call_operand.hbm [shape: f32[16,128], index: 2, kind: input, shape index: {}]   ;;  %s790_s3 = inlined_call_operand.hbm [shape: f32[16,128], index: 3, kind: output, shape index: {}]  }
   0x1   :  { %795 = sst [smem:[#allocation15_spill]] %s788_s1  ;;  %s403_s14 = scalar_lea.hbm %s787_s0, 16 }
   0x2   :  { %796 = sst [smem:[#allocation16_spill]] %s789_s2  ;;  %p404_p0 = scmp.ne.s32.totalorder %s787_s0, %s403_s14 }
   0x3   :  { %p407_p1 = scmp.lt.u32.totalorder %s403_s14, %s787_s0 }
   0x5   :  { %p409_p2 = pnand %p407_p1, %p404_p0 }
   0x7   :  { %412 = shalt.err (!%p409_p2)  }
   0x8   :  { %s545_s19 = smov [#allocation4]  }
   0x9   :  { %9 = dma.hbm_to_smem %s787_s0, 16, %s545_s19, [#allocation3] }
   0xa   :  { %515 = dma.done.wait [#allocation3], 16 }
   0xb   :  { %516 = vsyncadd [#allocation3], 4294967280 }
   0xc   :  { %11 = sfence }
   0xd   :  { %12 = vsyncpa [#allocation6], 0 }
   0xe   :  { %13 = vsyncpa [#allocation9], 0 }
   0xf   :  { %15 = vsyncpa [#allocation9 + $0x1], 0 }
  0x10   :  { %16 = vsyncpa [#allocation7], 0 }
  0x11   :  { %18 = vsyncpa [#allocation7 + $0x1], 0  ;;  %s583_s22 = smov 0   ;;  %s585_s23 = smov 0  }
  0x12   :  { %s587_s24 = smov 0   ;;  %s589_s25 = smov 0  }
  0x13 LB: > { %s604_s0 = sadd.s32 4294967295, %s543_s25   ;;  %s328_s26 = sadd.s32 4294967294, %s543_s25   ;;  %s543_s25 = sphi %s589_s25, %s816_s25   ;;  %s539_s24 = sphi %s587_s24, %s815_s24   ;;  %s535_s23 = sphi %s585_s23, %s814_s23   ;;  %s531_s22 = sphi %s583_s22, %s813_s22  }
  0x14   : > { %p65_p3 = scmp.ne.s32.totalorder %s535_s23, %s531_s22  ;;  %p791_p4 = scmp.eq.s32.totalorder %s604_s0, 0 }
  0x15   : > { %p95_p6 = scmp.eq.s32.totalorder %s328_s26, 1  ;;  %p329_p8 = scmp.ge.s32.totalorder %s543_s25, 1 }
  0x16   : > { %p613_p7 = por %p791_p4, %p65_p3  ;;  %p102_p10 = scmp.lt.s32.totalorder %s543_s25, 3 }
  0x17   : > { %p618_p9 = por %p95_p6, %p65_p3  ;;  %s546_s30 = smov [#allocation5]  }
  0x18   : > { %s797_s27 = scalar_select %p613_p7, 1, 0 }
  0x19   : > { %s798_s28 = scalar_select %p618_p9, 1, 0 }
  0x1a   : > { %p623_p11 = pnand %p329_p8, %p102_p10  ;;  %s114_s4 = sshll.u32 %s546_s30, 4  ;;  %s627_s4 = int_to_ptr.vmem [resolvable:$true] %s114_s4 }
  0x1b   : > { %s639_s6 = sadd.s32 1, %s543_s25   ;;  %s52_s7 = sadd.s32 1, %s539_s24 }
  0x1c   : > { %s799_s29 = scalar_select %p623_p11, 1, 0 }
  0x1d   : > { %p351_p12 = pneg %p623_p11  ;;  %s49_s8 = ssub.s32 %s543_s25, %s639_s6 }
  0x1e   : > { %s801_s1 = sld [smem:[#allocation15_spill]] }
  0x1f   : > { %p634_p0 = pnand %p351_p12, %p791_p4 }
  0x21   : > { %p415_p2 = pneg %p634_p0 }
  0x24   : > { %s413_s11 = scalar_lea.hbm %s801_s1, 1664 }
  0x25   : > { %p414_p1 = scmp.ne.s32.totalorder %s801_s1, %s413_s11  ;;  %p420_p8 = scmp.lt.u32.totalorder %s413_s11, %s801_s1 }
  0x27   : > { %p416_p3 = pnand %p415_p2, %p414_p1 }
  0x29   : > { %p417_p6 = pneg %p416_p3 }
  0x2b   : > { %p422_p10 = pnand %p420_p8, %p417_p6 }
  0x2d   : > { %425 = shalt.err (!%p422_p10)
}
  0x2e   : > { %s426_s16 = scalar_lea.vmem %s627_s4, 1664  ;;  %p434_p5 = scmp.lt.s32.totalorder %s627_s4, %s627_s4 }
  0x2f   : > { %p427_p12 = scmp.ne.s32.totalorder %s627_s4, %s426_s16  ;;  %p435_p9 = scmp.lt.s32.totalorder %s426_s16, %s426_s16 }
  0x31   : > { %p429_p13 = pnand %p427_p12, %p415_p2  ;;  %p436_p7 = por %p435_p9, %p434_p5 }
  0x33   : > { %p430_p4 = pneg %p429_p13 }
  0x35   : > { %p437_p11 = pnand %p436_p7, %p430_p4 }
  0x37   : > { %440 = shalt.err (!%p437_p11)
}
  0x38   : > { %s547_s17 = smov 128   ;;  %s548_s18 = smov 8  }
  0x39   : > { %354 = dma.hbm_to_vmem [thread:$0]  (!%p634_p0), %s801_s1, 1664, %s627_s4, [#allocation6], %s547_s17, %s547_s17, %s548_s18  }
  0x3a   : > { %p50_p5 = scmp.eq.s32.totalorder %s49_s8, 0  ;;  %p59_p4 = scmp.ne.s32.totalorder %s539_s24, %s535_s23 }
  0x3b   : > { %p60_p7 = scmp.eq.s32.totalorder %s543_s25, 0  ;;  %p364_p9 = scmp.lt.s32.totalorder %s543_s25, 2 }
  0x3c   : > { %s670_s21 = scalar_select %p50_p5, %s539_s24, %s52_s7  }
  0x3d   : > { %p61_p11 = por %p60_p7, %p59_p4  ;;  %p802_p13 = scmp.eq.s32.totalorder %s604_s0, 1 }
  0x3e   : > { %s128_s30 = sand.u32 1, %s539_s24   ;;  %s333_s9 = sshll.u32 %s543_s25, 7 }
  0x3f   : > { %p674_p1 = por %p802_p13, %p59_p4  ;;  %s332_s10 = sshll.u32 %s128_s30, 3 }
  0x40   : > { %s804_s2 = sld [smem:[#allocation16_spill]]  ;;  %s132_s4 = scalar_lea.vmem [#allocation8], %s332_s10 }
  0x41   : > { %s139_s7 = sshll.u32 %s132_s4, 4  ;;  %p685_p0 = pnand %p364_p9, %p61_p11  ;;  %s689_s7 = int_to_ptr.vmem [resolvable:$true] %s139_s7 }
  0x42   : > { %s129_s13 = scalar_lea.sflag [#allocation9], %s128_s30 }
  0x43   : > { %p443_p3 = pneg %p685_p0 }
  0x46   : > { %s683_s12 = scalar_lea.hbm %s804_s2, %s333_s9  ;;  %s446_s17 = scalar_lea.hbm %s804_s2, 256 }
  0x47   : > { %s441_s14 = scalar_lea.hbm %s683_s12, 128  ;;  %p447_p10 = scmp.lt.u32.totalorder %s683_s12, %s804_s2 }
  0x48   : > { %p442_p2 = scmp.ne.s32.totalorder %s683_s12, %s441_s14  ;;  %p448_p12 = scmp.lt.u32.totalorder %s446_s17, %s441_s14 }
  0x49   : > { %p450_p4 = scmp.lt.u32.totalorder %s441_s14, %s683_s12 }
  0x4a   : > { %p444_p6 = pnand %p443_p3, %p442_p2  ;;  %p449_p5 = por %p448_p12, %p447_p10 }
  0x4c   : > { %p445_p8 = pneg %p444_p6  ;;  %p451_p7 = por %p450_p4, %p449_p5 }
  0x4e   : > { %p452_p9 = pnand %p451_p7, %p445_p8 }
  0x50   : > { %455 = shalt.err (!%p452_p9)
}
  0x51   : > { %s456_s20 = scalar_lea.vmem %s689_s7, 128  ;;  %s549_s30 = smov [#allocation8]  }
  0x52   : > { %p457_p11 = scmp.ne.s32.totalorder %s689_s7, %s456_s20  ;;  %s461_s9 = sshll.u32 %s549_s30, 4  ;;  %s462_s9 = int_to_ptr.vmem [resolvable:$false] %s461_s9 }
  0x53   : > { %s463_s10 = scalar_lea.vmem %s462_s9, 256  ;;  %p464_p6 = scmp.lt.s32.totalorder %s689_s7, %s462_s9 }
  0x54   : > { %p459_p13 = pnand %p457_p11, %p443_p3  ;;  %p465_p10 = scmp.lt.s32.totalorder %s463_s10, %s456_s20 }
  0x56   : > { %p460_p2 = pneg %p459_p13  ;;  %p466_p12 = por %p465_p10, %p464_p6 }
  0x58   : > { %p467_p5 = pnand %p466_p12, %p460_p2 }
  0x5a   : > { %470 = shalt.err (!%p467_p5)
}
  0x5b   : > { %358 = dma.hbm_to_vmem [thread:$0]  (!%p685_p0), %s683_s12, 128, %s689_s7, %s129_s13  }
  0x5c   : > { %p806_p8 = scmp.ne.s32.totalorder %s799_s29, 0 }
  0x5d   : > { %p807_p3 = scmp.eq.s32.totalorder (!%p806_p8), %s604_s0, 0 }
  0x5e   : > { %148 = sbr.rel (%p806_p8) target bundleno = 149 (0x95), region = 28 }
  0x65   : > { %518 = dma.done.wait (%p807_p3), [#allocation6], 1664   ;;  %p808_p4 = pmov %p807_p3 }
  0x66   : > { %s723_s5 = sand.u32 1, %s535_s23   ;;  %p809_p0 = scmp.ne.s32.totalorder %s797_s27, 0 }
  0x67   : > { %520 = vsyncadd (%p808_p4), [#allocation6], 4294965632  ;;  %s794_s11 = sshll.u32 %s723_s5, 3  ;;  %s155_s4 = scalar_lea.sflag [#allocation9], %s723_s5 }
  0x68   : > { %s729_s12 = scalar_lea.vmem [#allocation8], %s794_s11 }
  0x69   : > { %522 = dma.done.wait (%p809_p0), %s155_s4, 128  }
  0x6a   : > { %524 = vsyncadd (%p809_p0), %s155_s4, 4294967168  ;;  %s338_s29 = sshll.u32 %s604_s0, 3  ;;  %v221_v9 = vld [vmem:[%s729_s12] sm:$0xff] }
  0x6b   : > { %s180_s7 = sld [smem:[#allocation4 + %s338_s29]]  ;;  %s184_s8 = sadd.s32 1, %s338_s29 }
  0x6c   : > { %s185_s13 = sld [smem:[#allocation4 + %s184_s8]]  ;;  %s189_s14 = sadd.s32 2, %s338_s29 }
  0x6d   : > { %s190_s15 = sld [smem:[#allocation4 + %s189_s14]]  ;;  %s194_s16 = sadd.s32 3, %s338_s29 }
  0x6e   : > { %s195_s17 = sld [smem:[#allocation4 + %s194_s16]]  ;;  %s199_s18 = sadd.s32 4, %s338_s29 }
  0x6f   : > { %s200_s19 = sld [smem:[#allocation4 + %s199_s18]]  ;;  %s204_s20 = sadd.s32 5, %s338_s29 }
  0x70   : > { %s205_s30 = sld [smem:[#allocation4 + %s204_s20]]  ;;  %s209_s9 = sadd.s32 6, %s338_s29 }
  0x71   : > { %s210_s10 = sld [smem:[#allocation4 + %s209_s9]]  ;;  %s181_s11 = scalar_lea.vmem [#allocation5], %s180_s7 }
  0x72   : > { %v182_v0 = vld [vmem:[%s181_s11] sm:$0x1]  ;;  %s214_s1 = sadd.s32 7, %s338_s29  ;;  %s186_s27 = scalar_lea.vmem [#allocation5], %s185_s13 }
  0x73   : > { %183 = vst [vmem:[#allocation2] sm:$0x1] %v182_v0  ;;  %v187_v1 = vld [vmem:[%s186_s27] sm:$0x1]  ;;  %s215_s4 = sld [smem:[#allocation4 + %s214_s1]]  ;;  %s191_s2 = scalar_lea.vmem [#allocation5], %s190_s15 }
  0x74   : > { %188 = vst [vmem:[#allocation2 + $0x1] sm:$0x1] %v187_v1  ;;  %v192_v2 = vld [vmem:[%s191_s2] sm:$0x1]  ;;  %s196_s8 = scalar_lea.vmem [#allocation5], %s195_s17  ;;  %s810_s2 = sshll.u32 %s723_s5, 3 }
  0x75   : > { %193 = vst [vmem:[#allocation2 + $0x2] sm:$0x1] %v192_v2  ;;  %v197_v3 = vld [vmem:[%s196_s8] sm:$0x1]  ;;  %s201_s14 = scalar_lea.vmem [#allocation5], %s200_s19  ;;  %s178_s29 = scalar_lea.vmem [#allocation10], %s810_s2 }
  0x76   : > { %198 = vst [vmem:[#allocation2 + $0x3] sm:$0x1] %v197_v3  ;;  %v202_v4 = vld [vmem:[%s201_s14] sm:$0x1]  ;;  %s206_s7 = scalar_lea.vmem [#allocation5], %s205_s30  ;;  %s238_s13 = sshll.u32 %s178_s29, 4  ;;  %s740_s13 = int_to_ptr.vmem [resolvable:$true] %s238_s13 }
  0x77   : > { %203 = vst [vmem:[#allocation2 + $0x4] sm:$0x1] %v202_v4  ;;  %v207_v5 = vld [vmem:[%s206_s7] sm:$0x1]  ;;  %s211_s11 = scalar_lea.vmem [#allocation5], %s210_s10  ;;  %s340_s15 = sshll.u32 %s604_s0, 7 }
  0x78   : > { %208 = vst [vmem:[#allocation2 + $0x5] sm:$0x1] %v207_v5  ;;  %v212_v6 = vld [vmem:[%s211_s11] sm:$0x1]  ;;  %s745_s18 = scalar_lea.hbm %s790_s3, %s340_s15  ;;  %s225_s19 = scalar_lea.sflag [#allocation7], %s723_s5 }
  0x79   : > { %213 = vst [vmem:[#allocation2 + $0x6] sm:$0x1] %v212_v6  ;;  %s216_s1 = scalar_lea.vmem [#allocation5], %s215_s4  ;;  %s471_s20 = scalar_lea.vmem %s740_s13, 128 }
  0x7a   : > { %v217_v7 = vld [vmem:[%s216_s1] sm:$0x1]  ;;  %p472_p7 = scmp.ne.s32.totalorder %s740_s13, %s471_s20  ;;  %s550_s0 = smov [#allocation10]  }
  0x7b   : > { %218 = vst [vmem:[#allocation2 + $0x7] sm:$0x1] %v217_v7  ;;  %s475_s12 = sshll.u32 %s550_s0, 4  ;;  %s476_s12 = int_to_ptr.vmem [resolvable:$false] %s475_s12 }
  0x7c   : > { %p473_p9 = pnand %p472_p7, %p674_p1  ;;  %s477_s30 = scalar_lea.vmem %s476_s12, 256 }
  0x7d   : > { %p478_p13 = scmp.lt.s32.totalorder %s740_s13, %s476_s12  ;;  %p479_p2 = scmp.lt.s32.totalorder %s477_s30, %s471_s20 }
  0x7e   : > { %p474_p11 = pneg %p473_p9 }
  0x7f   : > { %p480_p6 = por %p479_p2, %p478_p13 }
  0x81   : > { %p481_p10 = pnand %p480_p6, %p474_p11 }
  0x82   : > { %v219_v8 = vld [vmem:[#allocation2] sm:$0xff] }
  0x83   : > { %v220_v10 = vmul.f32 11.313708, %v219_v8 }
  0x85   : > { %v222_v11 = vadd.f32 %v221_v9, %v220_v10 }
  0x87   : > { %223 = vst [vmem:[%s178_s29] sm:$0xff] %v222_v11 }
  0x88   : > { %484 = shalt.err (!%p481_p10)
}
  0x89   : > { %s485_s5 = scalar_lea.hbm %s745_s18, 128  ;;  %s489_s27 = scalar_lea.hbm %s790_s3, 256 }
  0x8a   : > { %p486_p12 = scmp.ne.s32.totalorder %s745_s18, %s485_s5  ;;  %p490_p3 = scmp.lt.u32.totalorder %s745_s18, %s790_s3 }
  0x8b   : > { %p491_p4 = scmp.lt.u32.totalorder %s489_s27, %s485_s5  ;;  %p493_p7 = scmp.lt.u32.totalorder %s485_s5, %s745_s18 }
  0x8c   : > { %p487_p5 = pnand %p486_p12, %p674_p1 }
  0x8d   : > { %p492_p0 = por %p491_p4, %p490_p3 }
  0x8e   : > { %p488_p8 = pneg %p487_p5 }
  0x8f   : > { %p494_p9 = por %p493_p7, %p492_p0 }
  0x91   : > { %p495_p11 = pnand %p494_p9, %p488_p8 }
  0x93   : > { %498 = shalt.err (!%p495_p11)
}
  0x94   : > { %349 = dma.vmem_to_hbm [thread:$0]  (%p674_p1), %s740_s13, 128, %s745_s18, %s225_s19  }
  0x95 PF: > { %s250_s14 = sand.u32 1, %s531_s22   ;;  %p811_p13 = scmp.ne.s32.totalorder %s798_s28, 0 }
  0x96   : > { %p812_p2 = scmp.ge.s32.totalorder %s543_s25, 2  ;;  %s251_s7 = scalar_lea.sflag [#allocation7], %s250_s14 }
  0x98   : > { %p360_p6 = pnand %p812_p2, %p811_p13 }
  0x9a   : > { %526 = dma.done.wait (!%p360_p6), %s251_s7, 128  }
  0x9b   : > { %528 = vsyncadd (!%p360_p6), %s251_s7, 4294967168  ;;  %p21_p10 = scmp.ge.s32.totalorder %s639_s6, 4   ;;  %s813_s22 = smov %s535_s23 }
  0x9c   : > { %s814_s23 = smov %s539_s24  ;;  %s815_s24 = smov %s670_s21 }
  0x9d   : > { %s816_s25 = smov %s639_s6  ;;  %23 = sbr.rel (!%p21_p10) target bundleno = 19 (0x13), region = 86 }
  0xa4   :  { %256 = vsyncpa [#allocation6], 1 }
  0xa5   :  { %258 = vsyncpa [#allocation6 + $0x1], 1 }
  0xa6   :  { %259 = vsyncpa [#allocation9], 1 }
  0xa7   :  { %261 = vsyncpa [#allocation9 + $0x1], 1 }
  0xa8   :  { %262 = vsyncpa [#allocation7], 1 }
  0xa9   :  { %264 = vsyncpa [#allocation7 + $0x1], 1 }

</bundles_post_ra>
